<compile_context>
chip_gen: v5e
topology: v5e:2x2
jax: 0.10.0
libtpu: 0.0.40
codegen_flags: <defaults>
</compile_context>

<pallas_src>
import jax
import jax.numpy as jnp
from jax.experimental import pallas as pl
from jax.experimental.pallas import tpu as pltpu

TB_MAX = 512      # max batch-tile rows per grid step (tunable)
MIN_SPLIT = 256   # if padded batch >= this, use >=2 grid steps (v7x megacore)
LANE = 128        # lane width for the padded, lane-dense action head


def _round_up(x: int, m: int) -> int:
    return (x + m - 1) // m * m


def _pick_batch_tile(batch: int) -> int:
    """Batch tile: as large as possible (<= TB_MAX), multiple of 8 sublanes,
    and split into >=2 tiles when there is enough work for two TensorCores."""
    padded = max(8, _round_up(batch, 8))
    if padded <= TB_MAX:
        if padded >= MIN_SPLIT:
            # two roughly-even tiles so a "parallel" grid feeds both v7x cores
            return _round_up((padded + 1) // 2, 8)
        return padded
    return TB_MAX


def dqn_kernel(x_ref,
               w1_ref, b1_ref,
               w2_ref, b2_ref,
               w3_ref, b3_ref,
               w4_ref, b4_ref,
               w5_ref, b5_ref,
               out_ref):
    """Full MLP forward on one (TB, state_size) batch tile, entirely in VMEM.

    Matmuls run on the MXU with bf16 inputs and f32 accumulation; bias adds
    and ReLUs run in f32 on the VPU, then cast to bf16 for the next layer.
    """
    h = x_ref[...].astype(jnp.bfloat16)

    for w_ref, b_ref in ((w1_ref, b1_ref), (w2_ref, b2_ref),
                         (w3_ref, b3_ref), (w4_ref, b4_ref)):
        acc = jnp.dot(h, w_ref[...], preferred_element_type=jnp.float32)
        acc = acc + b_ref[...]
        h = jnp.maximum(acc, 0.0).astype(jnp.bfloat16)

    out = jnp.dot(h, w5_ref[...], preferred_element_type=jnp.float32)
    out = out + b5_ref[...]
    out_ref[...] = out.astype(out_ref.dtype)


def dqn_forward(state, params, *, out_dtype=jnp.bfloat16):
    """Batch-tiled Pallas call.

    `params` is a list of (W, b) with W shaped (in, out) and b (1, out), f32.
    Weights are cast to bf16 here; the final layer is zero-padded up to the
    next multiple of 128 output columns for lane-dense stores and the result
    is sliced back to (batch, action_size) before returning.
    """
    batch, state_size = state.shape
    action_size = params[-1][0].shape[1]
    out_pad = _round_up(max(action_size, 1), LANE)   # guard action_size > 128

    tb = _pick_batch_tile(batch)
    num_tiles = pl.cdiv(batch, tb)
    padded_batch = num_tiles * tb
    if padded_batch != batch:
        state = jnp.pad(state, ((0, padded_batch - batch), (0, 0)))

    # Flatten params: bf16 weights, f32 biases; pad the action head.
    flat = [state]
    n_layers = len(params)
    for i, (w, b) in enumerate(params):
        w = w.astype(jnp.bfloat16)
        b = b.astype(jnp.float32)
        if i == n_layers - 1 and w.shape[1] != out_pad:
            w = jnp.pad(w, ((0, 0), (0, out_pad - w.shape[1])))
            b = jnp.pad(b, ((0, 0), (0, out_pad - b.shape[1])))
        flat.append(w)
        flat.append(b)

    # Activations stream per batch tile; weights/biases are pinned resident
    # (constant block index across the grid).
    in_specs = [pl.BlockSpec((tb, state_size), lambda i: (i, 0))]
    for arr in flat[1:]:
        in_specs.append(pl.BlockSpec(arr.shape, lambda i: (0, 0)))
    out_specs = pl.BlockSpec((tb, out_pad), lambda i: (i, 0))

    # Advisory cost estimate, derived from the actual parameter shapes.
    flops = 0
    for i, (w, _) in enumerate(params):
        n_out = out_pad if i == n_layers - 1 else w.shape[1]
        flops += 2 * padded_batch * w.shape[0] * n_out
    bytes_accessed = int(state.size * state.dtype.itemsize
                         + sum(a.size * a.dtype.itemsize for a in flat[1:])
                         + padded_batch * out_pad * jnp.dtype(out_dtype).itemsize)

    out = pl.pallas_call(
        dqn_kernel,
        out_shape=jax.ShapeDtypeStruct((padded_batch, out_pad), out_dtype),
        grid=(num_tiles,),
        in_specs=in_specs,
        out_specs=out_specs,
        compiler_params=pltpu.CompilerParams(
            dimension_semantics=("parallel",),
            vmem_limit_bytes=32 * 1024 * 1024),
        cost_estimate=pl.CostEstimate(flops=flops, transcendentals=0,
                                      bytes_accessed=bytes_accessed),
    )(*flat)

    return out[:batch, :action_size]


def init_params(key, state_size, action_size):
    """Deterministic init mimicking PyTorch's U(-1/sqrt(fan_in), 1/sqrt(fan_in))."""
    dims = [state_size, 128, 256, 128, 128, action_size]
    params = []
    for i in range(len(dims) - 1):
        fan_in, fan_out = dims[i], dims[i + 1]
        key, kw, kb = jax.random.split(key, 3)
        bound = 1.0 / (fan_in ** 0.5)
        w = jax.random.uniform(kw, (fan_in, fan_out), jnp.float32, -bound, bound)
        b = jax.random.uniform(kb, (1, fan_out), jnp.float32, -bound, bound)
        params.append((w, b))
    return params


def dqn_reference(state, params):
    """Pure-JAX reference mirroring the kernel's dtype flow
    (bf16 MXU inputs, f32 accumulation, bf16 activations/output)."""
    h = state.astype(jnp.bfloat16)
    n = len(params)
    for i, (w, b) in enumerate(params):
        h = jnp.dot(h, w.astype(jnp.bfloat16),
                    preferred_element_type=jnp.float32) + b
        if i < n - 1:
            h = jnp.maximum(h, 0.0).astype(jnp.bfloat16)
    return h.astype(jnp.bfloat16)


if __name__ == "__main__":
    state_size = 8
    action_size = 4

    key = jax.random.PRNGKey(0)
    key, k_params = jax.random.split(key)
    params = init_params(k_params, state_size, action_size)

    # Small single-tile case and a multi-tile / padded-batch case.
    for batch in (8, 300):
        key, k_in = jax.random.split(key)
        state = jax.random.normal(k_in, (batch, state_size), jnp.float32)

        out = jax.block_until_ready(dqn_forward(state, params))
        ref = dqn_reference(state, params)

        assert out.shape == (batch, action_size)
        assert jnp.allclose(out.astype(jnp.float32), ref.astype(jnp.float32),
                            atol=2e-2, rtol=2e-2), f"mismatch vs reference (batch={batch})"

    print("KERNEL_OK")
</pallas_src>

<mosaic_0001>
module attributes {stable_mosaic.version = 11 : i64} {
  func.func @dqn_kernel(%arg0: i32, %arg1: memref<8x8xf32, #tpu.memory_space<vmem>>, %arg2: memref<8x128xbf16, #tpu.memory_space<vmem>>, %arg3: memref<1x128xf32, #tpu.memory_space<vmem>>, %arg4: memref<128x256xbf16, #tpu.memory_space<vmem>>, %arg5: memref<1x256xf32, #tpu.memory_space<vmem>>, %arg6: memref<256x128xbf16, #tpu.memory_space<vmem>>, %arg7: memref<1x128xf32, #tpu.memory_space<vmem>>, %arg8: memref<128x128xbf16, #tpu.memory_space<vmem>>, %arg9: memref<1x128xf32, #tpu.memory_space<vmem>>, %arg10: memref<128x128xbf16, #tpu.memory_space<vmem>>, %arg11: memref<1x128xf32, #tpu.memory_space<vmem>>, %arg12: memref<8x128xbf16, #tpu.memory_space<vmem>>) attributes {dimension_semantics = [#tpu.dimension_semantics<parallel>], iteration_bounds = array<i64: 1>, scalar_prefetch = 0 : i64, scratch_operands = 0 : i64, tpu.core_type = #tpu.core_type<tc>, window_params = [{transform_indices = @transform_0, window_bounds = array<i64: 8, 8>}, {pipeline_mode = #tpu.pipeline_mode<synchronous>, transform_indices = @transform_1, window_bounds = array<i64: 8, 128>}, {pipeline_mode = #tpu.pipeline_mode<synchronous>, transform_indices = @transform_2, window_bounds = array<i64: 1, 128>}, {pipeline_mode = #tpu.pipeline_mode<synchronous>, transform_indices = @transform_3, window_bounds = array<i64: 128, 256>}, {pipeline_mode = #tpu.pipeline_mode<synchronous>, transform_indices = @transform_4, window_bounds = array<i64: 1, 256>}, {pipeline_mode = #tpu.pipeline_mode<synchronous>, transform_indices = @transform_5, window_bounds = array<i64: 256, 128>}, {pipeline_mode = #tpu.pipeline_mode<synchronous>, transform_indices = @transform_6, window_bounds = array<i64: 1, 128>}, {pipeline_mode = #tpu.pipeline_mode<synchronous>, transform_indices = @transform_7, window_bounds = array<i64: 128, 128>}, {pipeline_mode = #tpu.pipeline_mode<synchronous>, transform_indices = @transform_8, window_bounds = array<i64: 1, 128>}, {pipeline_mode = #tpu.pipeline_mode<synchronous>, transform_indices = @transform_9, window_bounds = array<i64: 128, 128>}, {pipeline_mode = #tpu.pipeline_mode<synchronous>, transform_indices = @transform_10, window_bounds = array<i64: 1, 128>}, {transform_indices = @transform_11, window_bounds = array<i64: 8, 128>}]} {
    %c0 = arith.constant 0 : index
    %c0_0 = arith.constant 0 : index
    %0 = vector.load %arg1[%c0, %c0_0] : memref<8x8xf32, #tpu.memory_space<vmem>>, vector<8x8xf32>
    %1 = arith.truncf %0 : vector<8x8xf32> to vector<8x8xbf16>
    %c0_1 = arith.constant 0 : index
    %c0_2 = arith.constant 0 : index
    %2 = vector.load %arg2[%c0_1, %c0_2] : memref<8x128xbf16, #tpu.memory_space<vmem>>, vector<8x128xbf16>
    %cst = arith.constant dense<0.000000e+00> : vector<8x128xf32>
    %3 = tpu.matmul %1, %2, %cst {dimension_numbers = #tpu.dot_dimension_numbers<[1], [0], [0], [1], [0, 0, 1, 1], [], []>} : vector<8x8xbf16>, vector<8x128xbf16>, vector<8x128xf32> -> vector<8x128xf32>
    %c0_3 = arith.constant 0 : index
    %c0_4 = arith.constant 0 : index
    %4 = vector.load %arg3[%c0_3, %c0_4] : memref<1x128xf32, #tpu.memory_space<vmem>>, vector<1x128xf32>
    %5 = vector.broadcast %4 : vector<1x128xf32> to vector<8x128xf32>
    %6 = arith.addf %3, %5 : vector<8x128xf32>
    %cst_5 = arith.constant 0.000000e+00 : f32
    %7 = vector.broadcast %cst_5 : f32 to vector<8x128xf32>
    %8 = arith.maximumf %6, %7 : vector<8x128xf32>
    %9 = arith.truncf %8 : vector<8x128xf32> to vector<8x128xbf16>
    %c0_6 = arith.constant 0 : index
    %c0_7 = arith.constant 0 : index
    %10 = vector.load %arg4[%c0_6, %c0_7] : memref<128x256xbf16, #tpu.memory_space<vmem>>, vector<128x256xbf16>
    %cst_8 = arith.constant dense<0.000000e+00> : vector<8x256xf32>
    %11 = tpu.matmul %9, %10, %cst_8 {dimension_numbers = #tpu.dot_dimension_numbers<[1], [0], [0], [1], [0, 0, 1, 1], [], []>} : vector<8x128xbf16>, vector<128x256xbf16>, vector<8x256xf32> -> vector<8x256xf32>
    %c0_9 = arith.constant 0 : index
    %c0_10 = arith.constant 0 : index
    %12 = vector.load %arg5[%c0_9, %c0_10] : memref<1x256xf32, #tpu.memory_space<vmem>>, vector<1x256xf32>
    %13 = vector.broadcast %12 : vector<1x256xf32> to vector<8x256xf32>
    %14 = arith.addf %11, %13 : vector<8x256xf32>
    %cst_11 = arith.constant 0.000000e+00 : f32
    %15 = vector.broadcast %cst_11 : f32 to vector<8x256xf32>
    %16 = arith.maximumf %14, %15 : vector<8x256xf32>
    %17 = arith.truncf %16 : vector<8x256xf32> to vector<8x256xbf16>
    %c0_12 = arith.constant 0 : index
    %c0_13 = arith.constant 0 : index
    %18 = vector.load %arg6[%c0_12, %c0_13] : memref<256x128xbf16, #tpu.memory_space<vmem>>, vector<256x128xbf16>
    %cst_14 = arith.constant dense<0.000000e+00> : vector<8x128xf32>
    %19 = tpu.matmul %17, %18, %cst_14 {dimension_numbers = #tpu.dot_dimension_numbers<[1], [0], [0], [1], [0, 0, 1, 1], [], []>} : vector<8x256xbf16>, vector<256x128xbf16>, vector<8x128xf32> -> vector<8x128xf32>
    %c0_15 = arith.constant 0 : index
    %c0_16 = arith.constant 0 : index
    %20 = vector.load %arg7[%c0_15, %c0_16] : memref<1x128xf32, #tpu.memory_space<vmem>>, vector<1x128xf32>
    %21 = vector.broadcast %20 : vector<1x128xf32> to vector<8x128xf32>
    %22 = arith.addf %19, %21 : vector<8x128xf32>
    %cst_17 = arith.constant 0.000000e+00 : f32
    %23 = vector.broadcast %cst_17 : f32 to vector<8x128xf32>
    %24 = arith.maximumf %22, %23 : vector<8x128xf32>
    %25 = arith.truncf %24 : vector<8x128xf32> to vector<8x128xbf16>
    %c0_18 = arith.constant 0 : index
    %c0_19 = arith.constant 0 : index
    %26 = vector.load %arg8[%c0_18, %c0_19] : memref<128x128xbf16, #tpu.memory_space<vmem>>, vector<128x128xbf16>
    %cst_20 = arith.constant dense<0.000000e+00> : vector<8x128xf32>
    %27 = tpu.matmul %25, %26, %cst_20 {dimension_numbers = #tpu.dot_dimension_numbers<[1], [0], [0], [1], [0, 0, 1, 1], [], []>} : vector<8x128xbf16>, vector<128x128xbf16>, vector<8x128xf32> -> vector<8x128xf32>
    %c0_21 = arith.constant 0 : index
    %c0_22 = arith.constant 0 : index
    %28 = vector.load %arg9[%c0_21, %c0_22] : memref<1x128xf32, #tpu.memory_space<vmem>>, vector<1x128xf32>
    %29 = vector.broadcast %28 : vector<1x128xf32> to vector<8x128xf32>
    %30 = arith.addf %27, %29 : vector<8x128xf32>
    %cst_23 = arith.constant 0.000000e+00 : f32
    %31 = vector.broadcast %cst_23 : f32 to vector<8x128xf32>
    %32 = arith.maximumf %30, %31 : vector<8x128xf32>
    %33 = arith.truncf %32 : vector<8x128xf32> to vector<8x128xbf16>
    %c0_24 = arith.constant 0 : index
    %c0_25 = arith.constant 0 : index
    %34 = vector.load %arg10[%c0_24, %c0_25] : memref<128x128xbf16, #tpu.memory_space<vmem>>, vector<128x128xbf16>
    %cst_26 = arith.constant dense<0.000000e+00> : vector<8x128xf32>
    %35 = tpu.matmul %33, %34, %cst_26 {dimension_numbers = #tpu.dot_dimension_numbers<[1], [0], [0], [1], [0, 0, 1, 1], [], []>} : vector<8x128xbf16>, vector<128x128xbf16>, vector<8x128xf32> -> vector<8x128xf32>
    %c0_27 = arith.constant 0 : index
    %c0_28 = arith.constant 0 : index
    %36 = vector.load %arg11[%c0_27, %c0_28] : memref<1x128xf32, #tpu.memory_space<vmem>>, vector<1x128xf32>
    %37 = vector.broadcast %36 : vector<1x128xf32> to vector<8x128xf32>
    %38 = arith.addf %35, %37 : vector<8x128xf32>
    %39 = arith.truncf %38 : vector<8x128xf32> to vector<8x128xbf16>
    %c0_29 = arith.constant 0 : index
    %c0_30 = arith.constant 0 : index
    %40 = vector.load %arg12[%c0_29, %c0_30] : memref<8x128xbf16, #tpu.memory_space<vmem>>, vector<8x128xbf16>
    tpu.vector_store %arg12[%c0_29, %c0_30], %39 {strides = array<i32>} : memref<8x128xbf16, #tpu.memory_space<vmem>>, vector<8x128xbf16>,
    return
  }
  func.func @transform_0(%arg0: i32) -> (i32, i32) {
    %c0_i32 = arith.constant 0 : i32
    %c0_i32_0 = arith.constant 0 : i32
    return %arg0, %c0_i32 : i32, i32
  }
  func.func @transform_1(%arg0: i32) -> (i32, i32) {
    %c0_i32 = arith.constant 0 : i32
    %c0_i32_0 = arith.constant 0 : i32
    %c0_i32_1 = arith.constant 0 : i32
    return %c0_i32, %c0_i32_0 : i32, i32
  }
  func.func @transform_2(%arg0: i32) -> (i32, i32) {
    %c0_i32 = arith.constant 0 : i32
    %c0_i32_0 = arith.constant 0 : i32
    %c0_i32_1 = arith.constant 0 : i32
    return %c0_i32, %c0_i32_0 : i32, i32
  }
  func.func @transform_3(%arg0: i32) -> (i32, i32) {
    %c0_i32 = arith.constant 0 : i32
    %c0_i32_0 = arith.constant 0 : i32
    %c0_i32_1 = arith.constant 0 : i32
    return %c0_i32, %c0_i32_0 : i32, i32
  }
  func.func @transform_4(%arg0: i32) -> (i32, i32) {
    %c0_i32 = arith.constant 0 : i32
    %c0_i32_0 = arith.constant 0 : i32
    %c0_i32_1 = arith.constant 0 : i32
    return %c0_i32, %c0_i32_0 : i32, i32
  }
  func.func @transform_5(%arg0: i32) -> (i32, i32) {
    %c0_i32 = arith.constant 0 : i32
    %c0_i32_0 = arith.constant 0 : i32
    %c0_i32_1 = arith.constant 0 : i32
    return %c0_i32, %c0_i32_0 : i32, i32
  }
  func.func @transform_6(%arg0: i32) -> (i32, i32) {
    %c0_i32 = arith.constant 0 : i32
    %c0_i32_0 = arith.constant 0 : i32
    %c0_i32_1 = arith.constant 0 : i32
    return %c0_i32, %c0_i32_0 : i32, i32
  }
  func.func @transform_7(%arg0: i32) -> (i32, i32) {
    %c0_i32 = arith.constant 0 : i32
    %c0_i32_0 = arith.constant 0 : i32
    %c0_i32_1 = arith.constant 0 : i32
    return %c0_i32, %c0_i32_0 : i32, i32
  }
  func.func @transform_8(%arg0: i32) -> (i32, i32) {
    %c0_i32 = arith.constant 0 : i32
    %c0_i32_0 = arith.constant 0 : i32
    %c0_i32_1 = arith.constant 0 : i32
    return %c0_i32, %c0_i32_0 : i32, i32
  }
  func.func @transform_9(%arg0: i32) -> (i32, i32) {
    %c0_i32 = arith.constant 0 : i32
    %c0_i32_0 = arith.constant 0 : i32
    %c0_i32_1 = arith.constant 0 : i32
    return %c0_i32, %c0_i32_0 : i32, i32
  }
  func.func @transform_10(%arg0: i32) -> (i32, i32) {
    %c0_i32 = arith.constant 0 : i32
    %c0_i32_0 = arith.constant 0 : i32
    %c0_i32_1 = arith.constant 0 : i32
    return %c0_i32, %c0_i32_0 : i32, i32
  }
  func.func @transform_11(%arg0: i32) -> (i32, i32) {
    %c0_i32 = arith.constant 0 : i32
    %c0_i32_0 = arith.constant 0 : i32
    return %arg0, %c0_i32 : i32, i32
  }
}

</mosaic_0001>

<bundles_post_ra>
// kernel: tpu_custom_call.1
= control target key start
LH: loop header
LB: loop body
LE: loop exit
PB: predicated region body
PF: predicated region fallthrough
CT: control target
= control target key end

     0   :  { %16 = vsyncpa [#allocation3], 0  ;;  %s1188_s0 = inlined_call_operand.hbm [shape: f32[8,8], index: 0, kind: input, shape index: {}]   ;;  %s1189_s1 = inlined_call_operand.hbm [shape: bf16[8,128], index: 1, kind: input, shape index: {}]   ;;  %s1190_s2 = inlined_call_operand.vmem [shape: f32[1,128], index: 2, kind: input, shape index: {}]   ;;  %s1191_s3 = inlined_call_operand.hbm [shape: bf16[128,256], index: 3, kind: input, shape index: {}]   ;;  %s1192_s4 = inlined_call_operand.vmem [shape: f32[1,256], index: 4, kind: input, shape index: {}]   ;;  %s1193_s5 = inlined_call_operand.hbm [shape: bf16[256,128], index: 5, kind: input, shape index: {}]   ;;  %s1194_s6 = inlined_call_operand.vmem [shape: f32[1,128], index: 6, kind: input, shape index: {}]   ;;  %s1195_s7 = inlined_call_operand.hbm [shape: bf16[128,128], index: 7, kind: input, shape index: {}]   ;;  %s1196_s8 = inlined_call_operand.vmem [shape: f32[1,128], index: 8, kind: input, shape index: {}]   ;;  %s1197_s9 = inlined_call_operand.hbm [shape: bf16[128,128], index: 9, kind: input, shape index: {}]   ;;  %s1198_s10 = inlined_call_operand.vmem [shape: f32[1,128], index: 10, kind: input, shape index: {}]   ;;  %s1199_s11 = inlined_call_operand.hbm [shape: bf16[8,128], index: 11, kind: output, shape index: {}]  }
   0x1   :  { %17 = vsyncpa [#allocation6], 0 }
   0x2   :  { %18 = vsyncpa [#allocation9], 0 }
   0x3   :  { %19 = vsyncpa [#allocation12], 0  ;;  %s37_s19 = sshll.u32 %s1189_s1, 4  ;;  %s38_s19 = int_to_ptr.hbm [resolvable:$true] %s37_s19 }
   0x4   :  { %20 = vsyncpa [#allocation4], 0  ;;  %s1072_s20 = smov [#allocation5]   ;;  %s64_s24 = sshll.u32 %s1193_s5, 4  ;;  %s65_s24 = int_to_ptr.hbm [resolvable:$true] %s64_s24 }
   0x5   :  { %s39_s21 = sshll.u32 %s1072_s20, 4  ;;  %s1073_s25 = smov [#allocation8]   ;;  %s40_s21 = int_to_ptr.vmem [resolvable:$true] %s39_s21 }
   0x6   :  { %42 = dma.hbm_to_vmem [thread:$0]  %s38_s19, 64, %s40_s21, [#allocation6]  }
   0x7   :  { %s66_s26 = sshll.u32 %s1073_s25, 4  ;;  %s1074_s27 = smov 64   ;;  %s67_s26 = int_to_ptr.vmem [resolvable:$true] %s66_s26 }
   0x8   :  { %s1075_s28 = smov 4   ;;  %s26_s30 = sshll.u32 %s1188_s0, 4  ;;  %s27_s30 = int_to_ptr.hbm [resolvable:$true] %s26_s30 }
   0x9   :  { %72 = dma.hbm_to_vmem [thread:$0]  %s65_s24, 2048, %s67_s26, [#allocation9], %s1074_s27, %s1074_s27, %s1075_s28  }
   0xa   :  { %s1076_s12 = smov [#allocation2]   ;;  %s49_s15 = sshll.u32 %s1191_s3, 4  ;;  %s50_s15 = int_to_ptr.hbm [resolvable:$true] %s49_s15 }
   0xb   :  { %s28_s13 = sshll.u32 %s1076_s12, 4  ;;  %s1077_s16 = smov [#allocation7]   ;;  %s29_s13 = int_to_ptr.vmem [resolvable:$true] %s28_s13 }
   0xc   :  { %31 = dma.hbm_to_vmem [thread:$0]  %s27_s30, 128, %s29_s13, [#allocation3]  }
   0xd   :  { %s51_s17 = sshll.u32 %s1077_s16, 4  ;;  %s1078_s18 = smov 128   ;;  %s52_s17 = int_to_ptr.vmem [resolvable:$true] %s51_s17 }
   0xe   :  { %s1079_s19 = smov 8   ;;  %s79_s0 = sshll.u32 %s1195_s7, 4  ;;  %s80_s0 = int_to_ptr.hbm [resolvable:$true] %s79_s0 }
   0xf   :  { %57 = dma.hbm_to_vmem [thread:$0]  %s50_s15, 2048, %s52_s17, [#allocation6], %s1078_s18, %s1078_s18, %s1079_s19  }
  0x10   :  { %s1080_s22 = smov [#allocation10]   ;;  %s94_s3 = sshll.u32 %s1197_s9, 4  ;;  %s95_s3 = int_to_ptr.hbm [resolvable:$true] %s94_s3 }
  0x11   :  { %s81_s23 = sshll.u32 %s1080_s22, 4  ;;  %s1081_s26 = smov [#allocation11]   ;;  %s82_s23 = int_to_ptr.vmem [resolvable:$true] %s81_s23 }
  0x12   :  { %87 = dma.hbm_to_vmem [thread:$0]  %s80_s0, 1024, %s82_s23, [#allocation9], %s1074_s27, %s1074_s27, %s1075_s28  }
  0x13   :  { %s96_s1 = sshll.u32 %s1081_s26, 4  ;;  %s97_s1 = int_to_ptr.vmem [resolvable:$true] %s96_s1 }
  0x14   :  { %102 = dma.hbm_to_vmem [thread:$0]  %s95_s3, 1024, %s97_s1, [#allocation12], %s1074_s27, %s1074_s27, %s1075_s28  }
  0x15   :  { %1062 = dma.done.wait [#allocation3], 128  }
  0x16   :  { %1063 = vsyncadd [#allocation3], 4294967168 }
  0x17   :  { %1064 = dma.done.wait [#allocation6], 2112  }
  0x18   :  { %1065 = vsyncadd [#allocation6], 4294965184 }
  0x19   :  { %1066 = dma.done.wait [#allocation9], 3072  }
  0x1a   :  { %1067 = vsyncadd [#allocation9], 4294964224 }
  0x1b   :  { %1068 = dma.done.wait [#allocation12], 1024  }
  0x1c   :  { %1069 = vsyncadd [#allocation12], 4294966272  ;;  %vm141_vm0 = vcmask 1043456   ;;  %v132_v0 = vld [vmem:[#allocation5] sm:$0xf]  ;;  %v130_v1 = vld [vmem:[#allocation2] sm:$0xff] }
  0x1d   :  { %v697_v2 = vld [vmem:[#allocation7 + $0x70] sm:$0xf]  ;;  %v143_v3 = vsel %vm141_vm0, %v132_v0, 0  ;;  %v131_v4 = vpack.c.bf16 %v130_v1, %v130_v1  ;;  %vm137_vm1 = vcmask 64512   ;;  %v846_v5 = vld [vmem:[#allocation7 + $0x74] sm:$0xf0] }
  0x1e   :  { %v845_v6 = vld [vmem:[#allocation7 + $0x74] sm:$0xf]  ;;  %152 = vmatpush.bf16.msra.mxu0 %v143_v3  ;;  %v698_v7 = vor.u32 %v846_v5, %v697_v2  ;;  %v699_v8 = vld [vmem:[#allocation7 + $0x78] sm:$0xf0]  ;;  %v689_v9 = vld [vmem:[#allocation7 + $0x60] sm:$0xf] }
  0x1f   :  { %v844_v10 = vld [vmem:[#allocation7 + $0x64] sm:$0xf0]  ;;  %v702_v11 = vor.u32 %v845_v6, %v699_v8  ;;  %v843_v12 = vld [vmem:[#allocation7 + $0x64] sm:$0xf]  ;;  %v691_v13 = vld [vmem:[#allocation7 + $0x68] sm:$0xf0] }
  0x20   :  { %262 = vmatpush.bf16.msra.mxu1 %v698_v7  ;;  %v690_v14 = vor.u32 %v844_v10, %v689_v9  ;;  %v694_v15 = vor.u32 %v843_v12, %v691_v13  ;;  %v681_v16 = vld [vmem:[#allocation7 + $0x50] sm:$0xf]  ;;  %v842_v17 = vld [vmem:[#allocation7 + $0x54] sm:$0xf0]  ;;  %v841_v18 = vld [vmem:[#allocation7 + $0x54] sm:$0xf] }
  0x21   :  { %638 = vmatmul.msk.bf16.vlgmr.msra.gmra.mxu0 %vm137_vm1, %v131_v4  ;;  %275 = vmatpush.bf16.msra.mxu2 %v702_v11  ;;  %v683_v19 = vld [vmem:[#allocation7 + $0x58] sm:$0xf0]  ;;  %v682_v20 = vor.u32 %v842_v17, %v681_v16  ;;  %v673_v21 = vld [vmem:[#allocation7 + $0x40] sm:$0xf]  ;;  %v840_v22 = vld [vmem:[#allocation7 + $0x44] sm:$0xf0] }
  0x22   :  { %v686_v23 = vor.u32 %v841_v18, %v683_v19  ;;  %v839_v24 = vld [vmem:[#allocation7 + $0x44] sm:$0xf]  ;;  %v675_v25 = vld [vmem:[#allocation7 + $0x48] sm:$0xf0]  ;;  %v674_v26 = vor.u32 %v840_v22, %v673_v21  ;;  %v665_v28 = vld [vmem:[#allocation7 + $0x30] sm:$0xf] }
  0x23   :  { %v678_v27 = vor.u32 %v839_v24, %v675_v25  ;;  %v838_v29 = vld [vmem:[#allocation7 + $0x34] sm:$0xf0]  ;;  %v837_v30 = vld [vmem:[#allocation7 + $0x34] sm:$0xf]  ;;  %v667_v31 = vld [vmem:[#allocation7 + $0x38] sm:$0xf0] }
  0x24   :  { %263 = vmatpush.bf16.msra.mxu1 %v690_v14  ;;  %v666_v32 = vor.u32 %v838_v29, %v665_v28  ;;  %v670_v33 = vor.u32 %v837_v30, %v667_v31  ;;  %v657_v34 = vld [vmem:[#allocation7 + $0x20] sm:$0xf]  ;;  %v836_v35 = vld [vmem:[#allocation7 + $0x24] sm:$0xf0]  ;;  %v835_v36 = vld [vmem:[#allocation7 + $0x24] sm:$0xf] }
  0x25   :  { %276 = vmatpush.bf16.msra.mxu2 %v694_v15  ;;  %v659_v37 = vld [vmem:[#allocation7 + $0x28] sm:$0xf0]  ;;  %v658_v38 = vor.u32 %v836_v35, %v657_v34  ;;  %v649_v40 = vld [vmem:[#allocation7 + $0x10] sm:$0xf]  ;;  %v834_v41 = vld [vmem:[#allocation7 + $0x14] sm:$0xf0] }
  0x26   :  { %v662_v39 = vor.u32 %v835_v36, %v659_v37  ;;  %v833_v42 = vld [vmem:[#allocation7 + $0x14] sm:$0xf]  ;;  %v650_v43 = vor.u32 %v834_v41, %v649_v40  ;;  %v651_v44 = vld [vmem:[#allocation7 + $0x18] sm:$0xf0]  ;;  %v641_v46 = vld [vmem:[#allocation7] sm:$0xf] }
  0x27   :  { %v654_v45 = vor.u32 %v833_v42, %v651_v44  ;;  %v832_v47 = vld [vmem:[#allocation7 + $0x4] sm:$0xf0]  ;;  %v831_v48 = vld [vmem:[#allocation7 + $0x4] sm:$0xf]  ;;  %v643_v50 = vld [vmem:[#allocation7 + $0x8] sm:$0xf0] }
  0x28   :  { %264 = vmatpush.bf16.msra.mxu1 %v682_v20  ;;  %v642_v49 = vor.u32 %v832_v47, %v641_v46  ;;  %v646_v51 = vor.u32 %v831_v48, %v643_v50  ;;  %v854_v52 = vld [vmem:[#allocation8 + $0x38] sm:$0xff]  ;;  %v853_v54 = vld [vmem:[#allocation8 + $0x30] sm:$0xff]  ;;  %v852_v56 = vld [vmem:[#allocation8 + $0x28] sm:$0xff]  ;;  %s1082_s13 = smov [#allocation13]   ;;  %s625_s16 = sshll.u32 %s1199_s11, 4  ;;  %s626_s16 = int_to_ptr.hbm [resolvable:$true] %s625_s16 }
  0x29   :  { %277 = vmatpush.bf16.msra.mxu2 %v686_v23  ;;  %v862_v53 = vld [vmem:[#allocation8 + $0x78] sm:$0xff]  ;;  %424 = vmatpush.bf16.msra.mxu3 %v854_v52  ;;  %v861_v55 = vld [vmem:[#allocation8 + $0x70] sm:$0xff]  ;;  %v860_v57 = vld [vmem:[#allocation8 + $0x68] sm:$0xff]  ;;  %s623_s5 = sshll.u32 %s1082_s13, 4  ;;  %s624_s5 = int_to_ptr.vmem [resolvable:$true] %s623_s5 }
  0x2a   :  { %437 = vmatpush.bf16.msrb.mxu0 %v862_v53  ;;  %v851_v58 = vld [vmem:[#allocation8 + $0x20] sm:$0xff]  ;;  %v850_v60 = vld [vmem:[#allocation8 + $0x18] sm:$0xff]  ;;  %v849_v62 = vld [vmem:[#allocation8 + $0x10] sm:$0xff] }
  0x2b   :  { %v859_v59 = vld [vmem:[#allocation8 + $0x60] sm:$0xff]  ;;  %v858_v61 = vld [vmem:[#allocation8 + $0x58] sm:$0xff]  ;;  %v890_v63 = vld [vmem:[%s1190_s2] ss:$0 sm:$0xff] }
  0x2c   :  { %265 = vmatpush.bf16.msra.mxu1 %v674_v26  ;;  %v848_v5 = vld [vmem:[#allocation8 + $0x8] sm:$0xff]  ;;  %v857_v6 = vld [vmem:[#allocation8 + $0x50] sm:$0xff]  ;;  %v847_v7 = vld [vmem:[#allocation8] sm:$0xff] }
  0x2d   :  { %278 = vmatpush.bf16.msra.mxu2 %v678_v27  ;;  %425 = vmatpush.bf16.msra.mxu3 %v853_v54  ;;  %v856_v8 = vld [vmem:[#allocation8 + $0x48] sm:$0xff]  ;;  %v855_v9 = vld [vmem:[#allocation8 + $0x40] sm:$0xff]  ;;  %v870_v10 = vld [vmem:[#allocation10 + $0x38] sm:$0xff] }
  0x2e   :  { %438 = vmatpush.bf16.msrb.mxu0 %v861_v55  ;;  %v869_v11 = vld [vmem:[#allocation10 + $0x30] sm:$0xff]  ;;  %v868_v12 = vld [vmem:[#allocation10 + $0x28] sm:$0xff]  ;;  %v867_v13 = vld [vmem:[#allocation10 + $0x20] sm:$0xff] }
  0x2f   :  { %v176_v14 = vld [vmem:[%s1192_s4] sm:$0x3]  ;;  %v866_v15 = vld [vmem:[#allocation10 + $0x18] sm:$0xff]  ;;  %v864_v29 = vld [vmem:[#allocation10 + $0x8] sm:$0xff] }
  0x30   :  { %266 = vmatpush.bf16.msra.mxu1 %v666_v32  ;;  %v178_v16 = vperm.slane %v176_v14, 0  ;;  %v865_v18 = vld [vmem:[#allocation10 + $0x10] sm:$0xff]  ;;  %v179_v21 = vperm.slane %v176_v14, 1  ;;  %v863_v30 = vld [vmem:[#allocation10] sm:$0xff]  ;;  %v878_v31 = vld [vmem:[#allocation11 + $0x38] sm:$0xff] }
  0x31   :  { %279 = vmatpush.bf16.msra.mxu2 %v670_v33  ;;  %426 = vmatpush.bf16.msra.mxu3 %v852_v56  ;;  %v877_v32 = vld [vmem:[#allocation11 + $0x30] sm:$0xff]  ;;  %v876_v33 = vld [vmem:[#allocation11 + $0x28] sm:$0xff]  ;;  %v875_v34 = vld [vmem:[#allocation11 + $0x20] sm:$0xff] }
  0x32   :  { %439 = vmatpush.bf16.msrb.mxu0 %v860_v57  ;;  %v874_v35 = vld [vmem:[#allocation11 + $0x18] sm:$0xff]  ;;  %v873_v36 = vld [vmem:[#allocation11 + $0x10] sm:$0xff]  ;;  %v872_v46 = vld [vmem:[#allocation11 + $0x8] sm:$0xff] }
  0x33   :  { %v891_v37 = vld [vmem:[%s1194_s6] ss:$0 sm:$0xff]  ;;  %v871_v47 = vld [vmem:[#allocation11] sm:$0xff] }
  0x34   :  { %267 = vmatpush.bf16.msra.mxu1 %v658_v38  ;;  %v892_v48 = vld [vmem:[%s1196_s8] ss:$0 sm:$0xff] }
  0x35   :  { %280 = vmatpush.bf16.msra.mxu2 %v662_v39  ;;  %427 = vmatpush.bf16.msra.mxu3 %v851_v58  ;;  %v893_v54 = vld [vmem:[%s1198_s10] ss:$0 sm:$0xff] }
  0x36   :  { %440 = vmatpush.bf16.msrb.mxu0 %v859_v59 }
  0x38   :  { %268 = vmatpush.bf16.msra.mxu1 %v650_v43 }
  0x39   :  { %281 = vmatpush.bf16.msra.mxu2 %v654_v45  ;;  %428 = vmatpush.bf16.msra.mxu3 %v850_v60 }
  0x3a   :  { %441 = vmatpush.bf16.msrb.mxu0 %v858_v61 }
  0x3c   :  { %269 = vmatpush.bf16.msra.mxu1 %v642_v49 }
  0x3d   :  { %282 = vmatpush.bf16.msra.mxu2 %v646_v51  ;;  %429 = vmatpush.bf16.msra.mxu3 %v849_v62 }
  0x3e   :  { %442 = vmatpush.bf16.msrb.mxu0 %v857_v6 }
  0x40   :  { %520 = vmatpush.bf16.msrb.mxu1 %v870_v10 }
  0x41   :  { %430 = vmatpush.bf16.msra.mxu3 %v848_v5  ;;  %603 = vmatpush.bf16.msrb.mxu2 %v878_v31 }
  0x42   :  { %443 = vmatpush.bf16.msrb.mxu0 %v856_v8 }
  0x44   :  { %521 = vmatpush.bf16.msrb.mxu1 %v869_v11 }
  0x45   :  { %431 = vmatpush.bf16.msra.mxu3 %v847_v7  ;;  %604 = vmatpush.bf16.msrb.mxu2 %v877_v32 }
  0x46   :  { %444 = vmatpush.bf16.msrb.mxu0 %v855_v9 }
  0x48   :  { %522 = vmatpush.bf16.msrb.mxu1 %v868_v12 }
  0x49   :  { %605 = vmatpush.bf16.msrb.mxu2 %v876_v33 }
  0x4c   :  { %523 = vmatpush.bf16.msrb.mxu1 %v867_v13 }
  0x4d   :  { %606 = vmatpush.bf16.msrb.mxu2 %v875_v34 }
  0x50   :  { %524 = vmatpush.bf16.msrb.mxu1 %v866_v15 }
  0x51   :  { %607 = vmatpush.bf16.msrb.mxu2 %v874_v35 }
  0x54   :  { %525 = vmatpush.bf16.msrb.mxu1 %v865_v18 }
  0x55   :  { %608 = vmatpush.bf16.msrb.mxu2 %v873_v36 }
  0x58   :  { %526 = vmatpush.bf16.msrb.mxu1 %v864_v29 }
  0x59   :  { %609 = vmatpush.bf16.msrb.mxu2 %v872_v46 }
  0x5c   :  { %527 = vmatpush.bf16.msrb.mxu1 %v863_v30 }
  0x5d   :  { %610 = vmatpush.bf16.msrb.mxu2 %v871_v47 }
  0x9e   :  { %v154_v0 = vpop.f32.mrf.mxu0 }
  0x9f   :  { %v155_v1 = vadd.f32 %v890_v63, %v154_v0 }
  0xa1   :  { %v158_v2 = vmax.f32 %v155_v1, 0.0 }
  0xa3   :  { %v159_v3 = vpack.c.bf16 %v158_v2, %v158_v2 }
  0xa5   :  { %270 = vmatmul.bf16.vlgmr.msra.gmra.mxu1 %v159_v3  ;;  %283 = vmatmul.bf16.vlgmr.msra.gmra.mxu2 %v159_v3 }
  0xa6   :  { %v156_v4 = vpop.f32.mrf.mxu0 }
 0x122   :  { %v271_v17 = vpop.f32.mrf.mxu1 }
 0x123   :  { %v272_v19 = vadd.f32 %v271_v17, %v178_v16 }
 0x125   :  { %v288_v20 = vmax.f32 %v272_v19, 0.0 }
 0x127   :  { %v290_v22 = vpack.c.bf16 %v288_v20, %v288_v20 }
 0x128   :  { %v284_v23 = vpop.f32.mrf.mxu2 }
 0x129   :  { %v285_v24 = vadd.f32 %v284_v23, %v179_v21  ;;  %432 = vmatmul.bf16.vlgmr.msra.gmra.mxu3 %v290_v22 }
 0x12a   :  { %v273_v25 = vpop.f32.mrf.mxu1 }
 0x12b   :  { %v289_v26 = vmax.f32 %v285_v24, 0.0 }
 0x12d   :  { %v291_v27 = vpack.c.bf16 %v289_v26, %v289_v26 }
 0x12f   :  { %445 = vmatmul.bf16.vlgmr.msrb.gmra.mxu0 %v291_v27 }
 0x130   :  { %v286_v28 = vpop.f32.mrf.mxu2 }
 0x1ac   :  { %v433_v38 = vpop.f32.mrf.mxu3  ;;  %v446_v39 = vpop.f32.mrf.mxu0 }
 0x1ad   :  { %v434_v40 = vadd.f32 %v891_v37, %v433_v38 }
 0x1af   :  { %v447_v41 = vadd.f32 %v446_v39, %v434_v40 }
 0x1b1   :  { %v450_v42 = vmax.f32 %v447_v41, 0.0 }
 0x1b3   :  { %v451_v43 = vpack.c.bf16 %v450_v42, %v450_v42 }
 0x1b4   :  { %v435_v44 = vpop.f32.mrf.mxu3  ;;  %v448_v45 = vpop.f32.mrf.mxu0 }
 0x1b5   :  { %528 = vmatmul.bf16.vlgmr.msrb.gmra.mxu1 %v451_v43 }
 0x232   :  { %v529_v49 = vpop.f32.mrf.mxu1 }
 0x233   :  { %v530_v50 = vadd.f32 %v892_v48, %v529_v49 }
 0x235   :  { %v533_v51 = vmax.f32 %v530_v50, 0.0 }
 0x237   :  { %v534_v52 = vpack.c.bf16 %v533_v51, %v533_v51 }
 0x239   :  { %611 = vmatmul.bf16.vlgmr.msrb.gmra.mxu2 %v534_v52 }
 0x23a   :  { %v531_v53 = vpop.f32.mrf.mxu1 }
 0x2bc   :  { %v612_v55 = vpop.f32.mrf.mxu2 }
 0x2bd   :  { %v613_v56 = vadd.f32 %v893_v54, %v612_v55 }
 0x2bf   :  { %v616_v57 = vpack.c.bf16 %v613_v56, %v613_v56 }
 0x2c1   :  { %617 = vst [vmem:[#allocation13] sm:$0xf] %v616_v57 }
 0x2c2   :  { %628 = dma.vmem_to_hbm [thread:$0]  %s624_s5, 64, %s626_s16, [#allocation4]  }
 0x2c4   :  { %v614_v58 = vpop.f32.mrf.mxu2 }
 0x2c5   :  { %1070 = dma.done.wait [#allocation4], 64  }
 0x2c6   :  { %1071 = vsyncadd [#allocation4], 4294967232 }
 0x2c7   :  { %633 = vsyncpa [#allocation3], 1 }
 0x2c8   :  { %634 = vsyncpa [#allocation6], 1 }
 0x2c9   :  { %635 = vsyncpa [#allocation9], 1 }
 0x2ca   :  { %636 = vsyncpa [#allocation12], 1 }
 0x2cb   :  { %637 = vsyncpa [#allocation4], 1 }

</bundles_post_ra>
